<compile_context>
chip_gen: v5e
topology: v5e:2x2
jax: 0.10.0
libtpu: 0.0.40
codegen_flags: <defaults>
</compile_context>

<pallas_src>
import math

import jax
import jax.numpy as jnp
from jax import lax
from jax.experimental import pallas as pl
from jax.experimental.pallas import tpu as pltpu

_LANE = 128
_SUBLANE = 8
_NORM_EPS_SQ = 1e-24                  # torch F.normalize eps=1e-12, on ||.||^2
_VMEM_BUDGET = 32 * 1024 * 1024       # target for double-buffered blocks
_VMEM_LIMIT = 48 * 1024 * 1024        # explicit scoped-VMEM limit (safe on v5e/v6e/v7x)


def _round_up(v, m):
    return (v + m - 1) // m * m


def _logits_kernel(x_ref, wt_ref, invxn_ref, out_ref):
    # cos = (x_bf16 @ Wt_bf16) * rsqrt(||x row||^2); column norms are already
    # folded into Wt.  MXU matmul with f32 accumulation, bf16 store.
    raw = jnp.dot(x_ref[...], wt_ref[...], preferred_element_type=jnp.float32)
    out_ref[...] = (raw * invxn_ref[...]).astype(out_ref.dtype)


def _logits_stats_kernel(x_ref, wt_ref, invxn_ref, s_ref, out_ref, expsum_ref):
    """Cosine logits tile + fused AdaCos exp-sum epilogue.

    expsum (per batch row) accumulates sum_j exp(s_old * cos) over ALL padded
    class columns across the class-tile grid axis (axis 1, "arbitrary").
    Padded weight columns are exactly zero -> cos = 0 -> exp = 1 there; the
    constant B * pad_c surplus and the target-class terms are subtracted on
    the host, so no per-tile mask / one-hot work is needed here.
    """
    j = pl.program_id(1)
    raw = jnp.dot(x_ref[...], wt_ref[...], preferred_element_type=jnp.float32)
    cos = raw * invxn_ref[...]                     # (tb, tc) f32
    out_ref[...] = cos.astype(out_ref.dtype)       # bf16 store

    @pl.when(j == 0)
    def _():
        expsum_ref[...] = jnp.zeros_like(expsum_ref)

    s = s_ref[0, 0]                                # scalar from SMEM
    expsum_ref[...] += jnp.sum(jnp.exp(s * cos), axis=1, keepdims=True)


class AdaCosProduct:
    """JAX/Pallas re-implementation of the PyTorch AdaCosProduct forward."""

    def __init__(self, num_features, num_classes, m=0.5, *, key,
                 class_tile=512, batch_tile=1024):
        self.num_features = num_features
        self.n_classes = num_classes
        self.s = math.sqrt(2.0) * math.log(num_classes - 1)
        self.m = m  # unused in forward (matches the PyTorch module)

        # nn.init.xavier_uniform_ on (num_classes, num_features):
        # fan_in = num_features, fan_out = num_classes.
        bound = math.sqrt(6.0 / (num_features + num_classes))
        self.W = jax.random.uniform(
            key, (num_classes, num_features), dtype=jnp.float32,
            minval=-bound, maxval=bound)

        # Lane-dense class tile, shrunk if a single (F, tc) bf16 weight block
        # would blow the VMEM budget.
        tc = min(class_tile, _round_up(num_classes, _LANE))
        while tc > _LANE and 4 * (num_features * tc * 2) > _VMEM_BUDGET:
            tc = max(_LANE, _round_up(tc // 2, _LANE))
        self._tc = tc
        self._c_pad = _round_up(num_classes, tc)
        self._pad_c = self._c_pad - num_classes
        self._batch_tile = batch_tile

        # Fold the column norms into the stored weights (row-normalize in f32,
        # then transpose, pad with exact zeros, cast to bf16).  |cos| <= 1 up
        # to bf16 rounding, and padded columns give cos == 0 exactly.
        w_sq = jnp.sum(self.W * self.W, axis=1, keepdims=True)
        w_n = self.W * lax.rsqrt(jnp.maximum(w_sq, _NORM_EPS_SQ))
        self._Wt_bf16 = jnp.pad(
            w_n.T, ((0, 0), (0, self._pad_c))).astype(jnp.bfloat16)

    # ---- tiling helpers -------------------------------------------------

    def _pick_batch_tile(self, batch, want_split):
        b_req = _round_up(batch, _SUBLANE)
        tb = min(self._batch_tile, b_req)
        # Label path: keep >= 2 batch tiles when possible so megacore parts
        # (v7x: 2 TensorCores) both get work -- the class axis is "arbitrary".
        if want_split and tb >= 2 * _SUBLANE and b_req <= tb:
            tb = _round_up((tb + 1) // 2, _SUBLANE)

        feat, tc = self.num_features, self._tc

        def footprint(tb_):
            # double-buffered bf16 x / bf16 Wt / bf16 out + f32 (tb,1) vectors
            return 2 * (tb_ * feat * 2 + feat * tc * 2 + tb_ * tc * 2 + tb_ * 8)

        while tb > _SUBLANE and footprint(tb) > _VMEM_BUDGET:
            tb = max(_SUBLANE, _round_up(tb // 2, _SUBLANE))
        return tb

    # ---- forward --------------------------------------------------------

    def __call__(self, x, label=None):
        batch, feat = x.shape
        assert feat == self.num_features
        n_cls, c_pad, tc, pad_c = self.n_classes, self._c_pad, self._tc, self._pad_c

        tb = self._pick_batch_tile(batch, want_split=(label is not None))
        b_pad = _round_up(batch, tb)
        grid = (b_pad // tb, c_pad // tc)

        # Pre-cast x to bf16 once and precompute the f32 inverse row norms
        # (tiny XLA ops) -- halves the x stream and removes the per-tile
        # square/reduce/rsqrt from the kernel.
        x_f32 = x.astype(jnp.float32)
        inv_xn = lax.rsqrt(jnp.maximum(
            jnp.sum(x_f32 * x_f32, axis=1, keepdims=True), _NORM_EPS_SQ))
        x_bf16 = jnp.pad(x_f32.astype(jnp.bfloat16), ((0, b_pad - batch), (0, 0)))
        inv_xn = jnp.pad(inv_xn, ((0, b_pad - batch), (0, 0)))

        x_spec = pl.BlockSpec((tb, feat), lambda i, j: (i, 0))
        wt_spec = pl.BlockSpec((feat, tc), lambda i, j: (0, j))
        ixn_spec = pl.BlockSpec((tb, 1), lambda i, j: (i, 0))
        out_spec = pl.BlockSpec((tb, tc), lambda i, j: (i, j))
        vec_spec = pl.BlockSpec((tb, 1), lambda i, j: (i, 0))

        if label is None:
            logits = pl.pallas_call(
                _logits_kernel,
                out_shape=jax.ShapeDtypeStruct((b_pad, c_pad), jnp.bfloat16),
                grid=grid,
                in_specs=[x_spec, wt_spec, ixn_spec],
                out_specs=out_spec,
                compiler_params=pltpu.CompilerParams(
                    dimension_semantics=("parallel", "parallel"),
                    vmem_limit_bytes=_VMEM_LIMIT),
            )(x_bf16, self._Wt_bf16, inv_xn)
            # bf16 cosine logits; downstream consumers can fuse a cast if needed.
            return logits[:batch, :n_cls]

        s_old = jnp.reshape(jnp.asarray(self.s, jnp.float32), (1, 1))
        logits, expsum = pl.pallas_call(
            _logits_stats_kernel,
            out_shape=(jax.ShapeDtypeStruct((b_pad, c_pad), jnp.bfloat16),
                       jax.ShapeDtypeStruct((b_pad, 1), jnp.float32)),
            grid=grid,
            in_specs=[x_spec, wt_spec, ixn_spec,
                      pl.BlockSpec(memory_space=pltpu.MemorySpace.SMEM)],
            out_specs=(out_spec, vec_spec),
            compiler_params=pltpu.CompilerParams(
                dimension_semantics=("parallel", "arbitrary"),
                vmem_limit_bytes=_VMEM_LIMIT),
        )(x_bf16, self._Wt_bf16, inv_xn, s_old)

        # torch.no_grad() block: tiny per-batch scalar epilogue in plain JAX.
        lbl = jnp.asarray(label, jnp.int32)
        lbl_cos = logits[jnp.arange(batch), lbl].astype(jnp.float32)  # (B,) gather
        s_old_sc = s_old[0, 0]
        # B_avg numerator = sum over all padded positions
        #                   - padded-column surplus (exp(0)=1 each)
        #                   - target-class terms.
        b_sum = (jnp.sum(expsum[:batch, 0])
                 - jnp.float32(batch * pad_c)
                 - jnp.sum(jnp.exp(s_old_sc * lbl_cos)))
        b_avg = b_sum / batch
        theta = jnp.arccos(jnp.clip(lbl_cos, -1.0 + 1e-7, 1.0 - 1e-7))
        # torch.median -> lower median of B scalars (sort + pick).
        theta_med = jnp.sort(theta)[(batch - 1) // 2]
        s_new = jnp.log(b_avg) / jnp.cos(
            jnp.minimum(jnp.float32(math.pi / 4.0), theta_med))
        # TODO(synk): mirrors the in-place self.s update; would leak a tracer
        # if __call__ were jitted.
        self.s = s_new

        # bf16 logits * f32 scalar promotes to f32 (matches the torch output);
        # under jit the slice + scale fuse into the consumer.
        return s_new * logits[:batch, :n_cls]


def _reference_forward(W, s, x, label=None):
    """Pure-JAX f32 mirror of the PyTorch forward, for sanity checking."""
    xn = x / jnp.maximum(jnp.linalg.norm(x, axis=1, keepdims=True), 1e-12)
    wn = W / jnp.maximum(jnp.linalg.norm(W, axis=1, keepdims=True), 1e-12)
    logits = xn @ wn.T
    if label is None:
        return logits
    b, n_classes = x.shape[0], W.shape[0]
    theta = jnp.arccos(jnp.clip(logits, -1.0 + 1e-7, 1.0 - 1e-7))
    one_hot = jax.nn.one_hot(label, n_classes, dtype=logits.dtype)
    b_avg = jnp.sum(jnp.where(one_hot < 1, jnp.exp(s * logits), 0.0)) / b
    theta_lbl = jnp.sum(theta * one_hot, axis=1)
    theta_med = jnp.sort(theta_lbl)[(b - 1) // 2]
    s_new = jnp.log(b_avg) / jnp.cos(
        jnp.minimum(jnp.float32(math.pi / 4.0), theta_med))
    return s_new * logits


if __name__ == "__main__":
    num_features = 32
    num_classes = 16
    batch = 8

    key = jax.random.PRNGKey(0)
    k_w, k_x, k_lbl = jax.random.split(key, 3)

    model = AdaCosProduct(num_features, num_classes, key=k_w)
    x = jax.random.normal(k_x, (batch, num_features), dtype=jnp.float32)
    label = jax.random.randint(k_lbl, (batch,), 0, num_classes, dtype=jnp.int32)

    s_init = float(model.s)

    # label=None path: raw cosine logits (bf16).
    logits = model(x)
    jax.block_until_ready(logits)

    # label path: adaptive-scale logits (f32) + in-place self.s update.
    out = model(x, label)
    jax.block_until_ready(out)

    assert logits.shape == (batch, num_classes)
    assert out.shape == (batch, num_classes)

    # Sanity check against a pure-JAX f32 reference (kernel uses bf16 matmul
    # and bf16 logits storage).
    ref_logits = _reference_forward(model.W, s_init, x)
    ref_out = _reference_forward(model.W, s_init, x, label)
    assert bool(jnp.allclose(logits.astype(jnp.float32), ref_logits,
                             atol=3e-2)), "logits mismatch"
    assert bool(jnp.allclose(out, ref_out, atol=8e-2)), "output mismatch"

    print("KERNEL_OK")
</pallas_src>

<mosaic_0001>
module attributes {stable_mosaic.version = 11 : i64} {
  func.func @_logits_kernel(%arg0: i32, %arg1: i32, %arg2: memref<8x32xbf16, #tpu.memory_space<vmem>>, %arg3: memref<32x128xbf16, #tpu.memory_space<vmem>>, %arg4: memref<8x1xf32, #tpu.memory_space<vmem>>, %arg5: memref<8x128xbf16, #tpu.memory_space<vmem>>) attributes {dimension_semantics = [#tpu.dimension_semantics<parallel>, #tpu.dimension_semantics<parallel>], iteration_bounds = array<i64: 1, 1>, scalar_prefetch = 0 : i64, scratch_operands = 0 : i64, tpu.core_type = #tpu.core_type<tc>, window_params = [{transform_indices = @transform_0, window_bounds = array<i64: 8, 32>}, {transform_indices = @transform_1, window_bounds = array<i64: 32, 128>}, {transform_indices = @transform_2, window_bounds = array<i64: 8, 1>}, {transform_indices = @transform_3, window_bounds = array<i64: 8, 128>}]} {
    %c0 = arith.constant 0 : index
    %c0_0 = arith.constant 0 : index
    %0 = vector.load %arg2[%c0, %c0_0] : memref<8x32xbf16, #tpu.memory_space<vmem>>, vector<8x32xbf16>
    %c0_1 = arith.constant 0 : index
    %c0_2 = arith.constant 0 : index
    %1 = vector.load %arg3[%c0_1, %c0_2] : memref<32x128xbf16, #tpu.memory_space<vmem>>, vector<32x128xbf16>
    %cst = arith.constant dense<0.000000e+00> : vector<8x128xf32>
    %2 = tpu.matmul %0, %1, %cst {dimension_numbers = #tpu.dot_dimension_numbers<[1], [0], [0], [1], [0, 0, 1, 1], [], []>} : vector<8x32xbf16>, vector<32x128xbf16>, vector<8x128xf32> -> vector<8x128xf32>
    %c0_3 = arith.constant 0 : index
    %c0_4 = arith.constant 0 : index
    %3 = vector.load %arg4[%c0_3, %c0_4] : memref<8x1xf32, #tpu.memory_space<vmem>>, vector<8x1xf32>
    %4 = vector.broadcast %3 : vector<8x1xf32> to vector<8x128xf32>
    %5 = arith.mulf %2, %4 : vector<8x128xf32>
    %6 = arith.truncf %5 : vector<8x128xf32> to vector<8x128xbf16>
    %c0_5 = arith.constant 0 : index
    %c0_6 = arith.constant 0 : index
    %7 = vector.load %arg5[%c0_5, %c0_6] : memref<8x128xbf16, #tpu.memory_space<vmem>>, vector<8x128xbf16>
    tpu.vector_store %arg5[%c0_5, %c0_6], %6 {strides = array<i32>} : memref<8x128xbf16, #tpu.memory_space<vmem>>, vector<8x128xbf16>,
    return
  }
  func.func @transform_0(%arg0: i32, %arg1: i32) -> (i32, i32) {
    %c0_i32 = arith.constant 0 : i32
    %c0_i32_0 = arith.constant 0 : i32
    return %arg0, %c0_i32 : i32, i32
  }
  func.func @transform_1(%arg0: i32, %arg1: i32) -> (i32, i32) {
    %c0_i32 = arith.constant 0 : i32
    %c0_i32_0 = arith.constant 0 : i32
    return %c0_i32, %arg1 : i32, i32
  }
  func.func @transform_2(%arg0: i32, %arg1: i32) -> (i32, i32) {
    %c0_i32 = arith.constant 0 : i32
    %c0_i32_0 = arith.constant 0 : i32
    return %arg0, %c0_i32 : i32, i32
  }
  func.func @transform_3(%arg0: i32, %arg1: i32) -> (i32, i32) {
    %c0_i32 = arith.constant 0 : i32
    return %arg0, %arg1 : i32, i32
  }
}

</mosaic_0001>

<bundles_post_ra>
// kernel: tpu_custom_call.1
= control target key start
LH: loop header
LB: loop body
LE: loop exit
PB: predicated region body
PF: predicated region fallthrough
CT: control target
= control target key end

     0   :  { %8 = vsyncpa [#allocation3], 0  ;;  %s198_s0 = inlined_call_operand.vmem [shape: bf16[8,32], index: 0, kind: input, shape index: {}]   ;;  %s199_s1 = inlined_call_operand.hbm [shape: bf16[32,128], index: 1, kind: input, shape index: {}]   ;;  %s200_s2 = inlined_call_operand.vmem [shape: f32[8,1], index: 2, kind: input, shape index: {}]   ;;  %s201_s3 = inlined_call_operand.hbm [shape: bf16[8,128], index: 3, kind: output, shape index: {}]  }
   0x1   :  { %9 = vsyncpa [#allocation4], 0  ;;  %s16_s14 = sshll.u32 %s199_s1, 4  ;;  %s161_s15 = smov [#allocation2]   ;;  %s17_s14 = int_to_ptr.hbm [resolvable:$true] %s16_s14 }
   0x2   :  { %s18_s16 = sshll.u32 %s161_s15, 4  ;;  %s162_s17 = smov 64   ;;  %s19_s16 = int_to_ptr.vmem [resolvable:$true] %s18_s16 }
   0x3   :  { %s163_s18 = smov 4  }
   0x4   :  { %24 = dma.hbm_to_vmem [thread:$0]  %s17_s14, 256, %s19_s16, [#allocation3], %s162_s17, %s162_s17, %s163_s18  }
   0x5   :  { %157 = dma.done.wait [#allocation3], 256  }
   0x6   :  { %158 = vsyncadd [#allocation3], 4294967040  ;;  %v164_v0 = vmov 0   ;;  %v102_v1 = vld [vmem:[#allocation2 + $0x8] sm:$0xff]  ;;  %v66_v2 = vld [vmem:[%s200_s2] sm:$0xff]  ;;  %vm49_vm0 = vcmask 261120  }
   0x7   :  { %108 = vset.pattern.permute.xlu0 %v164_v0  ;;  %59 = vmatpush.bf16.msra.mxu0 %v102_v1  ;;  %v101_v3 = vld [vmem:[#allocation2] sm:$0xff]  ;;  %s165_s22 = smov [#allocation5]   ;;  %s82_s26 = sshll.u32 %s201_s3, 4  ;;  %s83_s26 = int_to_ptr.hbm [resolvable:$true] %s82_s26 }
   0x8   :  { %69 = vperm.xlu0 %108, %v66_v2   ;;  %v32_v4 = vld [vmem:[%s198_s0] sm:$0xf]  ;;  %s80_s23 = sshll.u32 %s165_s22, 4  ;;  %s81_s23 = int_to_ptr.vmem [resolvable:$true] %s80_s23 }
   0xb   :  { %60 = vmatpush.bf16.msra.mxu0 %v101_v3 }
   0xe   :  { %100 = vmatmul.msk.bf16.vlgmr.msra.gmra.mxu0 %vm49_vm0, %v32_v4 }
  0x7a   :  { %v70_v5 = vpop.permute.xlu0 %69 }
  0x8b   :  { %v62_v6 = vpop.f32.mrf.mxu0 }
  0x8c   :  { %v72_v7 = vmul.f32 %v70_v5, %v62_v6 }
  0x8e   :  { %v73_v8 = vpack.c.bf16 %v72_v7, %v72_v7 }
  0x90   :  { %74 = vst [vmem:[#allocation5] sm:$0xf] %v73_v8 }
  0x91   :  { %85 = dma.vmem_to_hbm [thread:$0]  %s81_s23, 64, %s83_s26, [#allocation4]  }
  0x93   :  { %v64_v9 = vpop.f32.mrf.mxu0 }
  0x94   :  { %159 = dma.done.wait [#allocation4], 64  }
  0x95   :  { %160 = vsyncadd [#allocation4], 4294967232 }
  0x96   :  { %90 = vsyncpa [#allocation3], 1 }
  0x97   :  { %91 = vsyncpa [#allocation4], 1 }

</bundles_post_ra>
